<compile_context>
chip_gen: v7x
topology: tpu7x:2x2x1
jax: 0.10.0
libtpu: 0.0.40
codegen_flags: <defaults>
</compile_context>

<pallas_src>
import jax
import jax.numpy as jnp
import numpy as np
from jax.experimental import pallas as pl
from jax.experimental.pallas import tpu as pltpu

NUM_PRIMITIVES = 4   # synthetic stand-ins for EDGE_PRIMITIVES


def edge_mixed_kernel(w_ref, x_ref, sub_ref, out_ref, acc_ref):
    # w_ref:   (NUM_PRIMITIVES,) f32 in SMEM (scalar reads, finalize only)
    # x_ref:   (ST, TD) native dtype in VMEM
    # sub_ref: (ST, TD) native dtype in VMEM
    # out_ref: (1, TD)  f32 in VMEM (same block across the S grid axis)
    # acc_ref: (NUM_PRIMITIVES, 8, TD) f32 VMEM scratch of running sublane maxima
    k = pl.program_id(1)

    @pl.when(k == 0)
    def _init():
        # Running max must start at -inf (not 0), or negative-only columns clamp.
        acc_ref[...] = jnp.full(acc_ref.shape, -jnp.inf, dtype=acc_ref.dtype)

    x = x_ref[...].astype(jnp.float32)
    sub = sub_ref[...].astype(jnp.float32)
    st, td = x.shape

    def slab_max(v):
        # (ST, TD) -> (ST//8, 8, TD) -> max over axis 0: splits the sublane axis
        # exactly at the (8, 128) tile boundary, so the reshape is layout-free and
        # the reduction is pure VPU (no cross-sublane XLU work in the hot loop).
        return jnp.max(v.reshape(st // 8, 8, td), axis=0)

    # --- synthetic EDGE_OPS; each computed & reduced immediately (one live temp) ---
    # TODO(synk): EDGE_PRIMITIVES / EDGE_OPS are undefined in the source module;
    #             these are deterministic placeholders with the right shape contract.
    acc_ref[0] = jnp.maximum(acc_ref[0], slab_max(sub))
    acc_ref[1] = jnp.maximum(acc_ref[1], slab_max(sub + x))   # ReLU hoisted to finalize
    acc_ref[2] = jnp.maximum(acc_ref[2], slab_max(sub * x))
    acc_ref[3] = jnp.maximum(acc_ref[3], slab_max(sub - x))

    @pl.when(k == pl.num_programs(1) - 1)
    def _finalize():
        # 8 -> 1 sublane collapse (XLU) and scalar weights applied once per tile.
        m0 = jnp.max(acc_ref[0], axis=0, keepdims=True)
        m1 = jnp.maximum(jnp.max(acc_ref[1], axis=0, keepdims=True), 0.0)  # exact ReLU hoist
        m2 = jnp.max(acc_ref[2], axis=0, keepdims=True)
        m3 = jnp.max(acc_ref[3], axis=0, keepdims=True)
        out_ref[...] = (w_ref[0] * m0 + w_ref[1] * m1
                        + w_ref[2] * m2 + w_ref[3] * m3)


def _pick_lane_tile(d, cap=1024):
    """Lane (last-dim) tile: a multiple of 128 dividing D, capped at D//2 when
    D >= 256 so the parallel D grid axis has >= 2 blocks (v7x has 2 TensorCores).
    Falls back to the full dimension (always a legal block shape)."""
    if d % 128 != 0:
        return d
    limit = min(cap, d // 2 if d >= 256 else d)
    t = max(128, (limit // 128) * 128)
    while t >= 128:
        if d % t == 0:
            return t
        t -= 128
    return d


def _pick_sublane_tile(s, cap=512):
    """Sublane tile: multiple of 8, bounded by `cap`.  S is edge-padded up to a
    multiple of this in the wrapper, so the per-step block never blows up for
    ragged / prime S (no full-(S, TD) fallback)."""
    s8 = ((s + 7) // 8) * 8
    return min(cap, s8)


def edge_mixed_op(x, sub_representations, weights):
    """weights: (1, NUM_PRIMITIVES) like self.weights; uses weights[0].
    Returns mixed of shape (1, D) float32, matching the PyTorch (1, l_dim) result."""
    S, D = sub_representations.shape
    assert x.shape == (S, D)
    assert S >= 1  # TODO(synk): the S == 0 CNN branch (return zeros) is not modeled.
    w = weights[0].astype(jnp.float32)

    # Inputs keep their native dtype (bf16 stays bf16): the kernel is HBM-BW
    # bound, so no wrapper-side astype (that would add a full HBM copy pass and
    # double the bytes the kernel has to stream).
    TD = _pick_lane_tile(D)
    ST = _pick_sublane_tile(S)

    # Ragged S: edge-replicate the last row up to a multiple of ST.  Duplicated
    # rows cannot change a row-wise max, so this is exact and needs no masking
    # (and avoids -inf poisoning of e.g. the sub*x primitive).
    pad = (-S) % ST
    if pad:
        x = jnp.pad(x, ((0, pad), (0, 0)), mode="edge")
        sub_representations = jnp.pad(sub_representations, ((0, pad), (0, 0)),
                                      mode="edge")
    S_pad = S + pad

    grid = (D // TD, S_pad // ST)
    itemsize = jnp.dtype(x.dtype).itemsize

    cost = pl.CostEstimate(
        flops=10 * S_pad * D,                                   # elementwise + maxes
        transcendentals=0,
        bytes_accessed=2 * S_pad * D * itemsize + D * 4 + NUM_PRIMITIVES * 4,
    )

    return pl.pallas_call(
        edge_mixed_kernel,
        out_shape=jax.ShapeDtypeStruct((1, D), jnp.float32),
        grid=grid,
        in_specs=[
            pl.BlockSpec(memory_space=pltpu.MemorySpace.SMEM),     # weights
            pl.BlockSpec((ST, TD), lambda j, k: (k, j)),           # x (native dtype)
            pl.BlockSpec((ST, TD), lambda j, k: (k, j)),           # sub_representations
        ],
        out_specs=pl.BlockSpec((1, TD), lambda j, k: (0, j)),      # resident across S axis
        scratch_shapes=[pltpu.VMEM((NUM_PRIMITIVES, 8, TD), jnp.float32)],
        compiler_params=pltpu.CompilerParams(
            dimension_semantics=("parallel", "arbitrary"),
            # Worst case (ST=512, TD=1024, f32): 2 inputs x 2 buffers x 2 MiB = 8 MiB
            # of pipeline buffers + tiny scratch; safe on all of v5e/v6e/v7x.
            vmem_limit_bytes=32 * 1024 * 1024,
        ),
        cost_estimate=cost,
        # TODO(synk): on v7x, sweeping pipeline_mode=pl.Buffered(3) on the x/sub
        #             specs may hide DMA issue jitter (<=5%); default depth kept here.
    )(w, x, sub_representations)


def _reference(x, sub, weights):
    # pure-numpy reference of the same semantics (computed from the same input
    # values the kernel sees, in float64)
    x = np.asarray(jnp.asarray(x, jnp.float32), dtype=np.float64)
    sub = np.asarray(jnp.asarray(sub, jnp.float32), dtype=np.float64)
    w = np.asarray(weights, dtype=np.float64)[0]
    ts = [sub,
          np.maximum(sub + x, 0.0),
          sub * x,
          sub - x]
    mixed = sum(wp * t.max(axis=0) for wp, t in zip(w, ts))
    return mixed[None, :].astype(np.float32)


if __name__ == "__main__":
    key = jax.random.PRNGKey(0)

    # deterministic architecture weights (row 0 is used, like self.weights[0])
    weights = jax.nn.softmax(
        jnp.linspace(-1.0, 1.0, NUM_PRIMITIVES, dtype=jnp.float32)
    )[None, :]

    # Case 1: module-consistent small shapes (sub_len=8, l_dim=32), f32.
    # Case 2: bf16 inputs, ragged S (edge-padding path), 2-block parallel D axis.
    # Case 3: f32, multi-step streaming reduction over S and split D axis.
    cases = [((8, 32), jnp.float32),
             ((1000, 256), jnp.bfloat16),
             ((1024, 1024), jnp.float32)]

    for (S, D), dtype in cases:
        k1, k2 = jax.random.split(jax.random.fold_in(key, S * 10007 + D))
        x = jax.random.normal(k1, (S, D), dtype=jnp.float32).astype(dtype)
        sub_representations = jax.random.normal(k2, (S, D), dtype=jnp.float32).astype(dtype)

        mixed = jax.block_until_ready(edge_mixed_op(x, sub_representations, weights))

        ref = _reference(x, sub_representations, weights)
        np.testing.assert_allclose(np.asarray(mixed), ref, rtol=1e-5, atol=1e-5)
        assert mixed.shape == (1, D) and mixed.dtype == jnp.float32

    print("KERNEL_OK")
</pallas_src>

<mosaic_0001>
module attributes {stable_mosaic.version = 11 : i64} {
  func.func @edge_mixed_kernel(%arg0: i32, %arg1: i32, %arg2: memref<4xf32, #tpu.memory_space<smem>>, %arg3: memref<8x32xf32, #tpu.memory_space<vmem>>, %arg4: memref<8x32xf32, #tpu.memory_space<vmem>>, %arg5: memref<1x32xf32, #tpu.memory_space<vmem>>, %arg6: memref<4x8x32xf32, #tpu.memory_space<vmem>>) attributes {dimension_semantics = [#tpu.dimension_semantics<parallel>, #tpu.dimension_semantics<arbitrary>], iteration_bounds = array<i64: 1, 1>, scalar_prefetch = 0 : i64, scratch_operands = 1 : i64, tpu.core_type = #tpu.core_type<tc>, window_params = [{transform_indices = @transform_0, window_bounds = array<i64: 4>}, {transform_indices = @transform_1, window_bounds = array<i64: 8, 32>}, {transform_indices = @transform_2, window_bounds = array<i64: 8, 32>}, {transform_indices = @transform_3, window_bounds = array<i64: 1, 32>}]} {
    %c0_i32 = arith.constant 0 : i32
    %0 = arith.cmpi eq, %arg1, %c0_i32 : i32
    %1 = arith.extui %0 : i1 to i32
    %c0_i32_0 = arith.constant 0 : i32
    %2 = arith.cmpi ne, %1, %c0_i32_0 : i32
    scf.if %2 {
      %cst_30 = arith.constant 0xFF800000 : f32
      %43 = vector.broadcast %cst_30 : f32 to vector<4x8x32xf32>
      %c0_31 = arith.constant 0 : index
      %c0_32 = arith.constant 0 : index
      %c0_33 = arith.constant 0 : index
      %44 = vector.load %arg6[%c0_31, %c0_32, %c0_33] : memref<4x8x32xf32, #tpu.memory_space<vmem>>, vector<4x8x32xf32>
      tpu.vector_store %arg6[%c0_31, %c0_32, %c0_33], %43 {strides = array<i32>} : memref<4x8x32xf32, #tpu.memory_space<vmem>>, vector<4x8x32xf32>,
    } else {
    }
    %c0 = arith.constant 0 : index
    %c0_1 = arith.constant 0 : index
    %3 = vector.load %arg3[%c0, %c0_1] : memref<8x32xf32, #tpu.memory_space<vmem>>, vector<8x32xf32>
    %c0_2 = arith.constant 0 : index
    %c0_3 = arith.constant 0 : index
    %4 = vector.load %arg4[%c0_2, %c0_3] : memref<8x32xf32, #tpu.memory_space<vmem>>, vector<8x32xf32>
    %c0_4 = arith.constant 0 : index
    %c0_5 = arith.constant 0 : index
    %c0_6 = arith.constant 0 : index
    %5 = vector.load %arg6[%c0_4, %c0_5, %c0_6] : memref<4x8x32xf32, #tpu.memory_space<vmem>>, vector<1x8x32xf32>
    %6 = vector.shape_cast %5 : vector<1x8x32xf32> to vector<8x32xf32>
    %7 = vector.shape_cast %4 : vector<8x32xf32> to vector<1x8x32xf32>
    %cst = arith.constant dense<0xFF800000> : vector<8x32xf32>
    %8 = vector.multi_reduction <maximumf>, %7, %cst [0] : vector<1x8x32xf32> to vector<8x32xf32>
    %9 = arith.maximumf %6, %8 : vector<8x32xf32>
    %c0_7 = arith.constant 0 : index
    %c0_8 = arith.constant 0 : index
    %c0_9 = arith.constant 0 : index
    %10 = vector.load %arg6[%c0_7, %c0_8, %c0_9] : memref<4x8x32xf32, #tpu.memory_space<vmem>>, vector<1x8x32xf32>
    %11 = vector.shape_cast %10 : vector<1x8x32xf32> to vector<8x32xf32>
    %12 = vector.shape_cast %9 : vector<8x32xf32> to vector<1x8x32xf32>
    tpu.vector_store %arg6[%c0_7, %c0_8, %c0_9], %12 {strides = array<i32>} : memref<4x8x32xf32, #tpu.memory_space<vmem>>, vector<1x8x32xf32>,
    %c1 = arith.constant 1 : index
    %c0_10 = arith.constant 0 : index
    %c0_11 = arith.constant 0 : index
    %13 = vector.load %arg6[%c1, %c0_10, %c0_11] : memref<4x8x32xf32, #tpu.memory_space<vmem>>, vector<1x8x32xf32>
    %14 = vector.shape_cast %13 : vector<1x8x32xf32> to vector<8x32xf32>
    %15 = arith.addf %4, %3 : vector<8x32xf32>
    %16 = vector.shape_cast %15 : vector<8x32xf32> to vector<1x8x32xf32>
    %cst_12 = arith.constant dense<0xFF800000> : vector<8x32xf32>
    %17 = vector.multi_reduction <maximumf>, %16, %cst_12 [0] : vector<1x8x32xf32> to vector<8x32xf32>
    %18 = arith.maximumf %14, %17 : vector<8x32xf32>
    %c1_13 = arith.constant 1 : index
    %c0_14 = arith.constant 0 : index
    %c0_15 = arith.constant 0 : index
    %19 = vector.load %arg6[%c1_13, %c0_14, %c0_15] : memref<4x8x32xf32, #tpu.memory_space<vmem>>, vector<1x8x32xf32>
    %20 = vector.shape_cast %19 : vector<1x8x32xf32> to vector<8x32xf32>
    %21 = vector.shape_cast %18 : vector<8x32xf32> to vector<1x8x32xf32>
    tpu.vector_store %arg6[%c1_13, %c0_14, %c0_15], %21 {strides = array<i32>} : memref<4x8x32xf32, #tpu.memory_space<vmem>>, vector<1x8x32xf32>,
    %c2 = arith.constant 2 : index
    %c0_16 = arith.constant 0 : index
    %c0_17 = arith.constant 0 : index
    %22 = vector.load %arg6[%c2, %c0_16, %c0_17] : memref<4x8x32xf32, #tpu.memory_space<vmem>>, vector<1x8x32xf32>
    %23 = vector.shape_cast %22 : vector<1x8x32xf32> to vector<8x32xf32>
    %24 = arith.mulf %4, %3 : vector<8x32xf32>
    %25 = vector.shape_cast %24 : vector<8x32xf32> to vector<1x8x32xf32>
    %cst_18 = arith.constant dense<0xFF800000> : vector<8x32xf32>
    %26 = vector.multi_reduction <maximumf>, %25, %cst_18 [0] : vector<1x8x32xf32> to vector<8x32xf32>
    %27 = arith.maximumf %23, %26 : vector<8x32xf32>
    %c2_19 = arith.constant 2 : index
    %c0_20 = arith.constant 0 : index
    %c0_21 = arith.constant 0 : index
    %28 = vector.load %arg6[%c2_19, %c0_20, %c0_21] : memref<4x8x32xf32, #tpu.memory_space<vmem>>, vector<1x8x32xf32>
    %29 = vector.shape_cast %28 : vector<1x8x32xf32> to vector<8x32xf32>
    %30 = vector.shape_cast %27 : vector<8x32xf32> to vector<1x8x32xf32>
    tpu.vector_store %arg6[%c2_19, %c0_20, %c0_21], %30 {strides = array<i32>} : memref<4x8x32xf32, #tpu.memory_space<vmem>>, vector<1x8x32xf32>,
    %c3 = arith.constant 3 : index
    %c0_22 = arith.constant 0 : index
    %c0_23 = arith.constant 0 : index
    %31 = vector.load %arg6[%c3, %c0_22, %c0_23] : memref<4x8x32xf32, #tpu.memory_space<vmem>>, vector<1x8x32xf32>
    %32 = vector.shape_cast %31 : vector<1x8x32xf32> to vector<8x32xf32>
    %33 = arith.subf %4, %3 : vector<8x32xf32>
    %34 = vector.shape_cast %33 : vector<8x32xf32> to vector<1x8x32xf32>
    %cst_24 = arith.constant dense<0xFF800000> : vector<8x32xf32>
    %35 = vector.multi_reduction <maximumf>, %34, %cst_24 [0] : vector<1x8x32xf32> to vector<8x32xf32>
    %36 = arith.maximumf %32, %35 : vector<8x32xf32>
    %c3_25 = arith.constant 3 : index
    %c0_26 = arith.constant 0 : index
    %c0_27 = arith.constant 0 : index
    %37 = vector.load %arg6[%c3_25, %c0_26, %c0_27] : memref<4x8x32xf32, #tpu.memory_space<vmem>>, vector<1x8x32xf32>
    %38 = vector.shape_cast %37 : vector<1x8x32xf32> to vector<8x32xf32>
    %39 = vector.shape_cast %36 : vector<8x32xf32> to vector<1x8x32xf32>
    tpu.vector_store %arg6[%c3_25, %c0_26, %c0_27], %39 {strides = array<i32>} : memref<4x8x32xf32, #tpu.memory_space<vmem>>, vector<1x8x32xf32>,
    %c0_i32_28 = arith.constant 0 : i32
    %40 = arith.cmpi eq, %arg1, %c0_i32_28 : i32
    %41 = arith.extui %40 : i1 to i32
    %c0_i32_29 = arith.constant 0 : i32
    %42 = arith.cmpi ne, %41, %c0_i32_29 : i32
    scf.if %42 {
      %c0_30 = arith.constant 0 : index
      %c0_31 = arith.constant 0 : index
      %c0_32 = arith.constant 0 : index
      %43 = vector.load %arg6[%c0_30, %c0_31, %c0_32] : memref<4x8x32xf32, #tpu.memory_space<vmem>>, vector<1x8x32xf32>
      %44 = vector.shape_cast %43 : vector<1x8x32xf32> to vector<8x32xf32>
      %cst_33 = arith.constant dense<0xFF800000> : vector<32xf32>
      %45 = vector.multi_reduction <maximumf>, %44, %cst_33 [0] : vector<8x32xf32> to vector<32xf32>
      %46 = vector.shape_cast %45 : vector<32xf32> to vector<1x32xf32>
      %c1_34 = arith.constant 1 : index
      %c0_35 = arith.constant 0 : index
      %c0_36 = arith.constant 0 : index
      %47 = vector.load %arg6[%c1_34, %c0_35, %c0_36] : memref<4x8x32xf32, #tpu.memory_space<vmem>>, vector<1x8x32xf32>
      %48 = vector.shape_cast %47 : vector<1x8x32xf32> to vector<8x32xf32>
      %cst_37 = arith.constant dense<0xFF800000> : vector<32xf32>
      %49 = vector.multi_reduction <maximumf>, %48, %cst_37 [0] : vector<8x32xf32> to vector<32xf32>
      %50 = vector.shape_cast %49 : vector<32xf32> to vector<1x32xf32>
      %cst_38 = arith.constant 0.000000e+00 : f32
      %51 = vector.broadcast %cst_38 : f32 to vector<1x32xf32>
      %52 = arith.maximumf %50, %51 : vector<1x32xf32>
      %c2_39 = arith.constant 2 : index
      %c0_40 = arith.constant 0 : index
      %c0_41 = arith.constant 0 : index
      %53 = vector.load %arg6[%c2_39, %c0_40, %c0_41] : memref<4x8x32xf32, #tpu.memory_space<vmem>>, vector<1x8x32xf32>
      %54 = vector.shape_cast %53 : vector<1x8x32xf32> to vector<8x32xf32>
      %cst_42 = arith.constant dense<0xFF800000> : vector<32xf32>
      %55 = vector.multi_reduction <maximumf>, %54, %cst_42 [0] : vector<8x32xf32> to vector<32xf32>
      %56 = vector.shape_cast %55 : vector<32xf32> to vector<1x32xf32>
      %c3_43 = arith.constant 3 : index
      %c0_44 = arith.constant 0 : index
      %c0_45 = arith.constant 0 : index
      %57 = vector.load %arg6[%c3_43, %c0_44, %c0_45] : memref<4x8x32xf32, #tpu.memory_space<vmem>>, vector<1x8x32xf32>
      %58 = vector.shape_cast %57 : vector<1x8x32xf32> to vector<8x32xf32>
      %cst_46 = arith.constant dense<0xFF800000> : vector<32xf32>
      %59 = vector.multi_reduction <maximumf>, %58, %cst_46 [0] : vector<8x32xf32> to vector<32xf32>
      %60 = vector.shape_cast %59 : vector<32xf32> to vector<1x32xf32>
      %c0_47 = arith.constant 0 : index
      %61 = memref.load %arg2[%c0_47] : memref<4xf32, #tpu.memory_space<smem>>
      %62 = vector.broadcast %61 : f32 to vector<1x32xf32>
      %63 = arith.mulf %62, %46 : vector<1x32xf32>
      %c1_48 = arith.constant 1 : index
      %64 = memref.load %arg2[%c1_48] : memref<4xf32, #tpu.memory_space<smem>>
      %65 = vector.broadcast %64 : f32 to vector<1x32xf32>
      %66 = arith.mulf %65, %52 : vector<1x32xf32>
      %67 = arith.addf %63, %66 : vector<1x32xf32>
      %c2_49 = arith.constant 2 : index
      %68 = memref.load %arg2[%c2_49] : memref<4xf32, #tpu.memory_space<smem>>
      %69 = vector.broadcast %68 : f32 to vector<1x32xf32>
      %70 = arith.mulf %69, %56 : vector<1x32xf32>
      %71 = arith.addf %67, %70 : vector<1x32xf32>
      %c3_50 = arith.constant 3 : index
      %72 = memref.load %arg2[%c3_50] : memref<4xf32, #tpu.memory_space<smem>>
      %73 = vector.broadcast %72 : f32 to vector<1x32xf32>
      %74 = arith.mulf %73, %60 : vector<1x32xf32>
      %75 = arith.addf %71, %74 : vector<1x32xf32>
      %c0_51 = arith.constant 0 : index
      %c0_52 = arith.constant 0 : index
      %76 = vector.load %arg5[%c0_51, %c0_52] : memref<1x32xf32, #tpu.memory_space<vmem>>, vector<1x32xf32>
      tpu.vector_store %arg5[%c0_51, %c0_52], %75 {strides = array<i32>} : memref<1x32xf32, #tpu.memory_space<vmem>>, vector<1x32xf32>,
    } else {
    }
    return
  }
  func.func @transform_0(%arg0: i32, %arg1: i32) -> i32 {
    %c0_i32 = arith.constant 0 : i32
    %c0_i32_0 = arith.constant 0 : i32
    return %c0_i32 : i32
  }
  func.func @transform_1(%arg0: i32, %arg1: i32) -> (i32, i32) {
    %c0_i32 = arith.constant 0 : i32
    return %arg1, %arg0 : i32, i32
  }
  func.func @transform_2(%arg0: i32, %arg1: i32) -> (i32, i32) {
    %c0_i32 = arith.constant 0 : i32
    return %arg1, %arg0 : i32, i32
  }
  func.func @transform_3(%arg0: i32, %arg1: i32) -> (i32, i32) {
    %c0_i32 = arith.constant 0 : i32
    %c0_i32_0 = arith.constant 0 : i32
    return %c0_i32, %arg0 : i32, i32
  }
}

</mosaic_0001>

<bundles_post_ra>
// kernel: tpu_custom_call.1
= control target key start
LH: loop header
LB: loop body
LE: loop exit
PB: predicated region body
PF: predicated region fallthrough
CT: control target
= control target key end

     0   :  { %8 = vsyncpa [#allocation6], 0  ;;  %s327_s0 = inlined_call_operand.hbm [shape: f32[4], index: 0, kind: input, shape index: {}]   ;;  %s328_s1 = inlined_call_operand.hbm [shape: f32[8,32], index: 1, kind: input, shape index: {}]   ;;  %s329_s2 = inlined_call_operand.hbm [shape: f32[8,32], index: 2, kind: input, shape index: {}]   ;;  %s330_s3 = inlined_call_operand.hbm [shape: f32[1,32], index: 3, kind: output, shape index: {}]  }
   0x1   :  { %9 = vsyncpa [#allocation4], 0 }
   0x2   :  { %10 = vsyncpa [#allocation9], 0 }
   0x3   :  { %11 = vsyncpa [#allocation5], 0  ;;  %s158_s14 = scalar_lea.hbm %s327_s0, 16 }
   0x4   :  { %p159_p0 = scmp.ne.s32.totalorder %s327_s0, %s158_s14  ;;  %p162_p1 = scmp.lt.u32.totalorder %s158_s14, %s327_s0 }
   0x6   :  { %p164_p2 = pnand %p162_p1, %p159_p0 }
   0x8   :  { %167 = shalt.err (!%p164_p2)
}
   0x9   :  { %s242_s19 = smov [#allocation3]   ;;  %s243_s22 = smov [#allocation7]  }
   0xa   :  { %19 = dma.hbm_to_smem %s327_s0, 16, %s242_s19, [#allocation6]  }
   0xb   :  { %s26_s23 = sshll.u32 %s243_s22, 4  ;;  %s244_s24 = smov [#allocation8]   ;;  %s27_s23 = int_to_ptr.vmem [resolvable:$true] %s26_s23 }
   0xc   :  { %s36_s25 = sshll.u32 %s244_s24, 4  ;;  %s168_s28 = scalar_lea.hbm %s328_s1, 128  ;;  %s37_s25 = int_to_ptr.vmem [resolvable:$true] %s36_s25 }
   0xd   :  { %p169_p3 = scmp.ne.s32.totalorder %s328_s1, %s168_s28  ;;  %p172_p4 = scmp.lt.u32.totalorder %s168_s28, %s328_s1 }
   0xf   :  { %p174_p5 = pnand %p172_p4, %p169_p3 }
  0x11   :  { %177 = shalt.err (!%p174_p5)
}
  0x12   :  { %s178_s0 = scalar_lea.vmem %s27_s23, 128  ;;  %p183_p7 = scmp.lt.s32.totalorder %s27_s23, %s27_s23 }
  0x13   :  { %p179_p6 = scmp.ne.s32.totalorder %s27_s23, %s178_s0  ;;  %p184_p8 = scmp.lt.s32.totalorder %s178_s0, %s178_s0 }
  0x15   :  { %p185_p9 = por %p184_p8, %p183_p7 }
  0x17   :  { %p186_p10 = pnand %p185_p9, %p179_p6 }
  0x19   :  { %189 = shalt.err (!%p186_p10)
}
  0x1a   :  { %29 = dma.hbm_to_vmem [thread:$0]  %s328_s1, 128, %s27_s23, [#allocation4]  }
  0x1b   :  { %s190_s10 = scalar_lea.hbm %s329_s2, 128 }
  0x1c   :  { %p191_p11 = scmp.ne.s32.totalorder %s329_s2, %s190_s10  ;;  %p194_p12 = scmp.lt.u32.totalorder %s190_s10, %s329_s2 }
  0x1e   :  { %p196_p13 = pnand %p194_p12, %p191_p11 }
  0x20   :  { %199 = shalt.err (!%p196_p13)
}
  0x21   :  { %s200_s15 = scalar_lea.vmem %s37_s25, 128  ;;  %p205_p1 = scmp.lt.s32.totalorder %s37_s25, %s37_s25 }
  0x22   :  { %p201_p0 = scmp.ne.s32.totalorder %s37_s25, %s200_s15  ;;  %p206_p2 = scmp.lt.s32.totalorder %s200_s15, %s200_s15 }
  0x24   :  { %p207_p3 = por %p206_p2, %p205_p1 }
  0x26   :  { %p208_p4 = pnand %p207_p3, %p201_p0 }
  0x28   :  { %211 = shalt.err (!%p208_p4)
}
  0x29   :  { %39 = dma.hbm_to_vmem [thread:$0]  %s329_s2, 128, %s37_s25, [#allocation9]  }
  0x2a   :  { %234 = dma.done.wait [#allocation6], 16  }
  0x2b   :  { %235 = vsyncadd [#allocation6], 4294967280 }
  0x2c   :  { %236 = dma.done.wait [#allocation4], 128  }
  0x2d   :  { %237 = vsyncadd [#allocation4], 4294967168 }
  0x2e   :  { %238 = dma.done.wait [#allocation9], 128  }
  0x2f   :  { %239 = vsyncadd [#allocation9], 4294967168 }
  0x30   :  { %49 = sfence }
  0x31   :  { %vm54_vm0 = vcmask 261120   ;;  %v245_v0 = vmov -inf   ;;  %v60_v1 = vld [vmem:[#allocation8] sm:$0xff]  ;;  %v59_v2 = vld [vmem:[#allocation7] sm:$0xff]  ;;  %s116_s2 = sld [smem:[#allocation3]]  ;;  %s150_s17 = sld [smem:[#allocation3 + $0x1]] }
  0x32   :  { %55 = vst.msk [vmem:[#allocation2] sm:$0xff] %vm54_vm0, %v245_v0  ;;  %56 = vst.msk [vmem:[#allocation2 + $0x8] sm:$0xff] %vm54_vm0, %v245_v0  ;;  %v67_v3 = vadd.f32 %v60_v1, %v59_v2  ;;  %v72_v4 = vmul.f32 %v60_v1, %v59_v2  ;;  %v77_v5 = vsub.f32 %v60_v1, %v59_v2  ;;  %s151_s18 = sld [smem:[#allocation3 + $0x2]]  ;;  %s152_s19 = sld [smem:[#allocation3 + $0x3]]  ;;  %vm131_vm1 = vcmask 253952  }
  0x33   :  { %57 = vst.msk [vmem:[#allocation2 + $0x10] sm:$0xff] %vm54_vm0, %v245_v0  ;;  %58 = vst.msk [vmem:[#allocation2 + $0x18] sm:$0xff] %vm54_vm0, %v245_v0  ;;  %s246_s20 = smov [#allocation10]  }
  0x34   :  { %s139_s21 = sshll.u32 %s246_s20, 4  ;;  %s140_s21 = int_to_ptr.vmem [resolvable:$true] %s139_s21 }
  0x35   :  { %s212_s22 = scalar_lea.vmem %s140_s21, 16  ;;  %s216_s23 = scalar_lea.vmem %s140_s21, 32 }
  0x36   :  { %p213_p5 = scmp.ne.s32.totalorder %s140_s21, %s212_s22  ;;  %p217_p6 = scmp.lt.s32.totalorder %s140_s21, %s140_s21 }
  0x37   :  { %v117_v44 = vstv %s116_s2  ;;  %v120_v45 = vstv %s150_s17  ;;  %p218_p7 = scmp.lt.s32.totalorder %s216_s23, %s212_s22 }
  0x38   :  { %v124_v48 = vstv %s151_s18  ;;  %v128_v52 = vstv %s152_s19 }
  0x39   :  { %v61_v6 = vld [vmem:[#allocation2] sm:$0xff]  ;;  %v66_v7 = vld [vmem:[#allocation2 + $0x8] sm:$0xff]  ;;  %p219_p8 = por %p218_p7, %p217_p6 }
  0x3a   :  { %v71_v8 = vld [vmem:[#allocation2 + $0x10] sm:$0xff]  ;;  %v62_v9 = vmax.f32 %v61_v6, %v60_v1  ;;  %v68_v10 = vmax.f32 %v66_v7, %v67_v3  ;;  %v76_v12 = vld [vmem:[#allocation2 + $0x18] sm:$0xff] }
  0x3b   :  { %v73_v11 = vmax.f32 %v71_v8, %v72_v4  ;;  %v78_v13 = vmax.f32 %v76_v12, %v77_v5  ;;  %p220_p9 = pnand %p219_p8, %p213_p5 }
  0x3c   :  { %64 = vst.msk [vmem:[#allocation2] sm:$0xff] %vm54_vm0, %v62_v9  ;;  %69 = vst.msk [vmem:[#allocation2 + $0x8] sm:$0xff] %vm54_vm0, %v68_v10 }
  0x3d   :  { %74 = vst.msk [vmem:[#allocation2 + $0x10] sm:$0xff] %vm54_vm0, %v73_v11  ;;  %79 = vst.msk [vmem:[#allocation2 + $0x18] sm:$0xff] %vm54_vm0, %v78_v13 }
  0x43   :  { %v83_v14 = vld [vmem:[#allocation2] sm:$0xff]  ;;  %v91_v15 = vld [vmem:[#allocation2 + $0x8] sm:$0xff] }
  0x44   :  { %v100_v16 = vld [vmem:[#allocation2 + $0x10] sm:$0xff]  ;;  %v84_v17 = vsel %vm54_vm0, %v83_v14, -inf  ;;  %v92_v18 = vsel %vm54_vm0, %v91_v15, -inf  ;;  %v108_v20 = vld [vmem:[#allocation2 + $0x18] sm:$0xff] }
  0x45   :  { %v101_v19 = vsel %vm54_vm0, %v100_v16, -inf  ;;  %v85_v21 = vrot.slane %v84_v17, 4  ;;  %v93_v22 = vrot.slane %v92_v18, 4  ;;  %v109_v24 = vsel %vm54_vm0, %v108_v20, -inf }
  0x46   :  { %v102_v23 = vrot.slane %v101_v19, 4  ;;  %v110_v25 = vrot.slane %v109_v24, 4 }
  0x47   :  { %v86_v26 = vmax.f32 %v84_v17, %v85_v21  ;;  %v94_v27 = vmax.f32 %v92_v18, %v93_v22 }
  0x48   :  { %v103_v28 = vmax.f32 %v101_v19, %v102_v23  ;;  %v111_v29 = vmax.f32 %v109_v24, %v110_v25 }
  0x49   :  { %v87_v30 = vrot.slane %v86_v26, 2  ;;  %v95_v31 = vrot.slane %v94_v27, 2 }
  0x4a   :  { %v104_v32 = vrot.slane %v103_v28, 2  ;;  %v112_v33 = vrot.slane %v111_v29, 2 }
  0x4b   :  { %v88_v34 = vmax.f32 %v86_v26, %v87_v30  ;;  %v96_v35 = vmax.f32 %v94_v27, %v95_v31 }
  0x4c   :  { %v105_v36 = vmax.f32 %v103_v28, %v104_v32  ;;  %v113_v37 = vmax.f32 %v111_v29, %v112_v33 }
  0x4d   :  { %v89_v38 = vrot.slane %v88_v34, 1  ;;  %v97_v39 = vrot.slane %v96_v35, 1 }
  0x4e   :  { %v106_v40 = vrot.slane %v105_v36, 1  ;;  %v114_v43 = vrot.slane %v113_v37, 1 }
  0x4f   :  { %v90_v41 = vmax.f32 %v88_v34, %v89_v38  ;;  %v98_v42 = vmax.f32 %v96_v35, %v97_v39 }
  0x50   :  { %v107_v47 = vmax.f32 %v105_v36, %v106_v40  ;;  %v115_v49 = vmax.f32 %v113_v37, %v114_v43 }
  0x51   :  { %v99_v46 = vmax.f32 %v98_v42, 0.0  ;;  %v118_v50 = vmul.f32 %v117_v44, %v90_v41 }
  0x52   :  { %v125_v54 = vmul.f32 %v124_v48, %v107_v47  ;;  %v129_v56 = vmul.f32 %v128_v52, %v115_v49 }
  0x53   :  { %v121_v51 = vmul.f32 %v120_v45, %v99_v46 }
  0x55   :  { %v122_v53 = vadd.f32 %v121_v51, %v118_v50 }
  0x57   :  { %v126_v55 = vadd.f32 %v125_v54, %v122_v53 }
  0x59   :  { %v130_v57 = vadd.f32 %v129_v56, %v126_v55 }
  0x5b   :  { %132 = vst.msk [vmem:[#allocation10] sm:$0x1] %vm131_vm1, %v130_v57 }
  0x5c   :  { %223 = shalt.err (!%p220_p9)
}
  0x5d   :  { %s224_s26 = scalar_lea.hbm %s330_s3, 16 }
  0x5e   :  { %p225_p10 = scmp.ne.s32.totalorder %s330_s3, %s224_s26  ;;  %p228_p11 = scmp.lt.u32.totalorder %s224_s26, %s330_s3 }
  0x60   :  { %p230_p12 = pnand %p228_p11, %p225_p10 }
  0x62   :  { %233 = shalt.err (!%p230_p12)
}
  0x63   :  { %142 = dma.vmem_to_hbm [thread:$0]  %s140_s21, 16, %s330_s3, [#allocation5]  }
  0x64   :  { %240 = dma.done.wait [#allocation5], 16  }
  0x65   :  { %241 = vsyncadd [#allocation5], 4294967280 }
  0x66   :  { %146 = vsyncpa [#allocation4], 1 }
  0x67   :  { %147 = vsyncpa [#allocation9], 1 }
  0x68   :  { %148 = vsyncpa [#allocation5], 1 }
  0x69   :  { %149 = vsyncpa [#allocation6], 1 }

</bundles_post_ra>
